<compile_context>
chip_gen: v7x
topology: tpu7x:2x2x1
jax: 0.10.0
libtpu: 0.0.40
codegen_flags: <defaults>
</compile_context>

<pallas_src>
import jax
import jax.numpy as jnp
from jax.experimental import pallas as pl
from jax.experimental.pallas import tpu as pltpu


def csnet_kernel(x_ref, w1_ref, b1_ref, w2_ref, b2_ref, o_ref):
    # hidden = relu(x @ W1 + b1)   -- bias added exactly once per tile
    h = jnp.dot(x_ref[...], w1_ref[...], preferred_element_type=jnp.float32)
    h = jnp.maximum(h + b1_ref[...], 0.0)          # f32 epilogue (v5e-safe)
    # out = hidden @ W2 + b2
    o = jnp.dot(h, w2_ref[...], preferred_element_type=jnp.float32)
    o_ref[...] = (o + b2_ref[...]).astype(o_ref.dtype)


def csnet_forward(x, w1, b1, w2, b2, *, batch_tile=1024):
    """relu(x @ w1 + b1) @ w2 + b2 via a fused Pallas TPU kernel.

    w1: (F, H), b1: (1, H), w2: (H, O), b2: (1, O). No padding anywhere.
    """
    B, F = x.shape
    H = w1.shape[1]
    O = w2.shape[1]

    if B <= batch_tile:
        # Tiny problem: no grid, no pipelining — whole working set lives in VMEM.
        out = pl.pallas_call(
            csnet_kernel,
            out_shape=jax.ShapeDtypeStruct((B, O), jnp.float32),
            in_specs=[pl.BlockSpec(memory_space=pltpu.MemorySpace.VMEM)] * 5,
            out_specs=pl.BlockSpec(memory_space=pltpu.MemorySpace.VMEM),
        )(x, w1, b1, w2, b2)
    else:
        # Large batch: tile only the batch axis. Weights/biases stay resident
        # (constant index_map) so the kernel streams only x in and out out.
        # Ragged last block is handled by Pallas masking (no pad / no slice).
        TB = batch_tile
        out = pl.pallas_call(
            csnet_kernel,
            out_shape=jax.ShapeDtypeStruct((B, O), jnp.float32),
            grid=(pl.cdiv(B, TB),),
            in_specs=[
                pl.BlockSpec((TB, F), lambda i: (i, 0)),
                pl.BlockSpec((F, H), lambda i: (0, 0)),
                pl.BlockSpec((1, H), lambda i: (0, 0)),
                pl.BlockSpec((H, O), lambda i: (0, 0)),
                pl.BlockSpec((1, O), lambda i: (0, 0)),
            ],
            out_specs=pl.BlockSpec((TB, O), lambda i: (i, 0)),
            compiler_params=pltpu.CompilerParams(
                # No cross-tile dependence -> shards across v7x's 2 TensorCores.
                dimension_semantics=("parallel",),
            ),
        )(x, w1, b1, w2, b2)

    return out


def init_params(key, n_feature, n_hidden, n_output):
    # Mimic torch.nn.Linear default init: U(-1/sqrt(fan_in), 1/sqrt(fan_in)).
    k1, k2, k3, k4 = jax.random.split(key, 4)
    lim1 = 1.0 / jnp.sqrt(n_feature)
    lim2 = 1.0 / jnp.sqrt(n_hidden)
    # Weights stored transposed relative to torch ((out,in) -> (in,out)).
    w1 = jax.random.uniform(k1, (n_feature, n_hidden), jnp.float32, -lim1, lim1)
    b1 = jax.random.uniform(k2, (1, n_hidden), jnp.float32, -lim1, lim1)
    w2 = jax.random.uniform(k3, (n_hidden, n_output), jnp.float32, -lim2, lim2)
    b2 = jax.random.uniform(k4, (1, n_output), jnp.float32, -lim2, lim2)
    return w1, b1, w2, b2


def _ref(x, w1, b1, w2, b2):
    return jnp.maximum(x @ w1 + b1, 0.0) @ w2 + b2


if __name__ == "__main__":
    key = jax.random.PRNGKey(0)
    kx, kp, kx2 = jax.random.split(key, 3)

    batch, n_feature, n_hidden, n_output = 8, 32, 64, 16
    w1, b1, w2, b2 = init_params(kp, n_feature, n_hidden, n_output)

    # --- small-batch (no-grid, fully VMEM-resident) path ---
    x = jax.random.normal(kx, (batch, n_feature), jnp.float32)
    out = jax.block_until_ready(csnet_forward(x, w1, b1, w2, b2))
    ref = _ref(x, w1, b1, w2, b2)
    assert out.shape == (batch, n_output)
    assert jnp.allclose(out, ref, atol=1e-5, rtol=1e-5)

    # --- large-batch (batch-tiled, ragged last block, weights-resident) path ---
    big_batch = 1000   # non-multiple of the tile to exercise ragged-block masking
    xb = jax.random.normal(kx2, (big_batch, n_feature), jnp.float32)
    out_b = jax.block_until_ready(
        csnet_forward(xb, w1, b1, w2, b2, batch_tile=256))
    ref_b = _ref(xb, w1, b1, w2, b2)
    assert out_b.shape == (big_batch, n_output)
    assert jnp.allclose(out_b, ref_b, atol=1e-4, rtol=1e-5)

    print("KERNEL_OK")
</pallas_src>

<mosaic_0001>
module attributes {stable_mosaic.version = 11 : i64} {
  func.func @csnet_kernel(%arg0: memref<8x32xf32, #tpu.memory_space<vmem>>, %arg1: memref<32x64xf32, #tpu.memory_space<vmem>>, %arg2: memref<1x64xf32, #tpu.memory_space<vmem>>, %arg3: memref<64x16xf32, #tpu.memory_space<vmem>>, %arg4: memref<1x16xf32, #tpu.memory_space<vmem>>, %arg5: memref<8x16xf32, #tpu.memory_space<vmem>>) attributes {dimension_semantics = [], scalar_prefetch = 0 : i64, scratch_operands = 0 : i64, tpu.core_type = #tpu.core_type<tc>} {
    %c0 = arith.constant 0 : index
    %c0_0 = arith.constant 0 : index
    %0 = vector.load %arg0[%c0, %c0_0] : memref<8x32xf32, #tpu.memory_space<vmem>>, vector<8x32xf32>
    %c0_1 = arith.constant 0 : index
    %c0_2 = arith.constant 0 : index
    %1 = vector.load %arg1[%c0_1, %c0_2] : memref<32x64xf32, #tpu.memory_space<vmem>>, vector<32x64xf32>
    %cst = arith.constant dense<0.000000e+00> : vector<8x64xf32>
    %2 = tpu.matmul %0, %1, %cst {dimension_numbers = #tpu.dot_dimension_numbers<[1], [0], [0], [1], [0, 0, 1, 1], [], []>} : vector<8x32xf32>, vector<32x64xf32>, vector<8x64xf32> -> vector<8x64xf32>
    %c0_3 = arith.constant 0 : index
    %c0_4 = arith.constant 0 : index
    %3 = vector.load %arg2[%c0_3, %c0_4] : memref<1x64xf32, #tpu.memory_space<vmem>>, vector<1x64xf32>
    %4 = vector.broadcast %3 : vector<1x64xf32> to vector<8x64xf32>
    %5 = arith.addf %2, %4 : vector<8x64xf32>
    %cst_5 = arith.constant 0.000000e+00 : f32
    %6 = vector.broadcast %cst_5 : f32 to vector<8x64xf32>
    %7 = arith.maximumf %5, %6 : vector<8x64xf32>
    %c0_6 = arith.constant 0 : index
    %c0_7 = arith.constant 0 : index
    %8 = vector.load %arg3[%c0_6, %c0_7] : memref<64x16xf32, #tpu.memory_space<vmem>>, vector<64x16xf32>
    %cst_8 = arith.constant dense<0.000000e+00> : vector<8x16xf32>
    %9 = tpu.matmul %7, %8, %cst_8 {dimension_numbers = #tpu.dot_dimension_numbers<[1], [0], [0], [1], [0, 0, 1, 1], [], []>} : vector<8x64xf32>, vector<64x16xf32>, vector<8x16xf32> -> vector<8x16xf32>
    %c0_9 = arith.constant 0 : index
    %c0_10 = arith.constant 0 : index
    %10 = vector.load %arg4[%c0_9, %c0_10] : memref<1x16xf32, #tpu.memory_space<vmem>>, vector<1x16xf32>
    %11 = vector.broadcast %10 : vector<1x16xf32> to vector<8x16xf32>
    %12 = arith.addf %9, %11 : vector<8x16xf32>
    %c0_11 = arith.constant 0 : index
    %c0_12 = arith.constant 0 : index
    %13 = vector.load %arg5[%c0_11, %c0_12] : memref<8x16xf32, #tpu.memory_space<vmem>>, vector<8x16xf32>
    tpu.vector_store %arg5[%c0_11, %c0_12], %12 {strides = array<i32>} : memref<8x16xf32, #tpu.memory_space<vmem>>, vector<8x16xf32>,
    return
  }
}

</mosaic_0001>

<bundles_post_ra>
// kernel: tpu_custom_call.1
= control target key start
LH: loop header
LB: loop body
LE: loop exit
PB: predicated region body
PF: predicated region fallthrough
CT: control target
= control target key end

     0   :  { %v307_v3 = vmov 0.0|0.0   ;;  %vm308_vm0 = vmmov 0   ;;  %v309_v6 = vmov 0.0   ;;  %s398_s0 = inlined_call_operand.vmem [shape: f32[8,32], index: 0, kind: input, shape index: {}]   ;;  %s399_s1 = inlined_call_operand.vmem [shape: f32[32,64], index: 1, kind: input, shape index: {}]   ;;  %s400_s2 = inlined_call_operand.vmem [shape: f32[1,64], index: 2, kind: input, shape index: {}]   ;;  %s401_s3 = inlined_call_operand.vmem [shape: f32[64,16], index: 3, kind: input, shape index: {}]   ;;  %s402_s4 = inlined_call_operand.vmem [shape: f32[1,16], index: 4, kind: input, shape index: {}]   ;;  %s403_s5 = inlined_call_operand.hbm [shape: f32[8,16], index: 5, kind: output, shape index: {}]  }
   0x1   :  { %v22_v0 = vld [vmem:[%s399_s1] sm:$0xff]  ;;  %v23_v1 = vld [vmem:[%s399_s1 + $0x8] sm:$0xff]  ;;  %v24_v2 = vld [vmem:[%s399_s1 + $0x10] sm:$0xff]  ;;  %261 = vmatprep.subr.bf16.mxu0 %v307_v3  ;;  %239 = vmatprep.mubr.msk.f32.mxu0 %vm308_vm0, %v309_v6 }
   0x2   :  { %v262_v4 = vpack.c.bf16 %v23_v1, %v22_v0  ;;  %v25_v5 = vld [vmem:[%s399_s1 + $0x18] sm:$0xff]  ;;  %v108_v7 = vld [vmem:[%s401_s3] sm:$0xff]  ;;  %267 = vmatprep.subr.bf16.mxu1 %v307_v3  ;;  %v109_v8 = vld [vmem:[%s401_s3 + $0x8] sm:$0xff]  ;;  %258 = vmatprep.mubr.msk.f32.mxu1 %vm308_vm0, %v309_v6 }
   0x3   :  { %v110_v9 = vld [vmem:[%s401_s3 + $0x10] sm:$0xff]  ;;  %v111_v10 = vld [vmem:[%s401_s3 + $0x18] sm:$0xff]  ;;  %v265_v11 = vpack.c.bf16 %v25_v5, %v24_v2  ;;  %v268_v12 = vpack.c.bf16 %v109_v8, %v108_v7 }
   0x4   :  { %263 = vmatpush3.bf16.msra.mxu0 %v262_v4 }
   0x5   :  { %264 = vmatprep.subr.bf16.mxu0 %v307_v3 }
   0x6   :  { %10 = vsyncpa [#allocation3], 0  ;;  %269 = vmatpush3.bf16.msra.mxu1 %v268_v12  ;;  %v271_v13 = vpack.c.bf16 %v111_v10, %v110_v9  ;;  %v112_v14 = vld [vmem:[%s401_s3 + $0x20] sm:$0xff]  ;;  %v113_v15 = vld [vmem:[%s401_s3 + $0x28] sm:$0xff]  ;;  %vm33_vm1 = vcmask 261120   ;;  %vm123_vm2 = vcmask 523264  }
   0x7   :  { %270 = vmatprep.subr.bf16.mxu1 %v307_v3  ;;  %v21_v16 = vld [vmem:[%s398_s0] sm:$0xff]  ;;  %v274_v17 = vpack.c.bf16 %v113_v15, %v112_v14  ;;  %v114_v18 = vld [vmem:[%s401_s3 + $0x30] sm:$0xff]  ;;  %v115_v19 = vld [vmem:[%s401_s3 + $0x38] sm:$0xff]  ;;  %s310_s21 = smov [#allocation2]   ;;  %vm197_vm3 = vcmask 130048  }
   0x8   :  { %266 = vmatpush3.bf16.msra.mxu0 %v265_v11  ;;  %v277_v20 = vpack.c.bf16 %v115_v19, %v114_v18  ;;  %v213_v21 = vld [vmem:[%s400_s2] ss:$0 sm:$0xff]  ;;  %s205_s22 = sshll.u32 %s310_s21, 4  ;;  %s206_s22 = int_to_ptr.vmem [resolvable:$true] %s205_s22 }
   0x9   :  { %v215_v26 = vld [vmem:[%s402_s4] ss:$0 sm:$0xff]  ;;  %s283_s3 = scalar_lea.vmem %s206_s22, 128  ;;  %p288_p1 = scmp.lt.s32.totalorder %s206_s22, %s206_s22 }
   0xa   :  { %272 = vmatpush3.bf16.msra.mxu1 %v271_v13  ;;  %p284_p0 = scmp.ne.s32.totalorder %s206_s22, %s283_s3  ;;  %p289_p2 = scmp.lt.s32.totalorder %s283_s3, %s283_s3 }
   0xb   :  { %240 = vmatmul.mubr.msk.f32.vlgmr.msra.gmra.mrb[0].mxu0 %vm33_vm1, %v21_v16  ;;  %273 = vmatprep.subr.bf16.mxu1 %v307_v3 }
   0xc   :  { %p290_p3 = por %p289_p2, %p288_p1 }
   0xe   :  { %275 = vmatpush3.bf16.msra.mxu1 %v274_v17  ;;  %p291_p4 = pnand %p290_p3, %p284_p0 }
   0xf   :  { %276 = vmatprep.subr.bf16.mxu1 %v307_v3 }
  0x12   :  { %278 = vmatpush3.bf16.msra.mxu1 %v277_v20 }
  0xde   :  { %v103_v22 = vpop.f32.mrb[0].mxu0 }
  0xdf   :  { %v104_v23 = vadd.f32 %v213_v21, %v103_v22  ;;  %v241_v24 = vpop.f32.mrb[1].mxu0 }
  0xe1   :  { %v107_v25 = vmax.f32 %v104_v23, 0.0 }
  0xe3   :  { %259 = vmatmul.mubr.msk.f32.vlgmr.msra.gmra.mrb[0].mxu1 %vm123_vm2, %v107_v25 }
 0x1b6   :  { %v193_v27 = vpop.f32.mrb[0].mxu1 }
 0x1b7   :  { %v194_v28 = vadd.f32 %v215_v26, %v193_v27  ;;  %v260_v29 = vpop.f32.mrb[1].mxu1 }
 0x1b9   :  { %198 = vst.msk [vmem:[#allocation2] sm:$0xff] %vm197_vm3, %v194_v28 }
 0x1ba   :  { %294 = shalt.err (!%p291_p4)
}
 0x1bb   :  { %s295_s24 = scalar_lea.hbm %s403_s5, 128 }
 0x1bc   :  { %p296_p5 = scmp.ne.s32.totalorder %s403_s5, %s295_s24  ;;  %p299_p6 = scmp.lt.u32.totalorder %s295_s24, %s403_s5 }
 0x1be   :  { %p301_p7 = pnand %p299_p6, %p296_p5 }
 0x1c0   :  { %304 = shalt.err (!%p301_p7)
}
 0x1c1   :  { %208 = dma.vmem_to_hbm [thread:$0]  %s206_s22, 128, %s403_s5, [#allocation3]  }
 0x1c2   :  { %305 = dma.done.wait [#allocation3], 128  }
 0x1c3   :  { %306 = vsyncadd [#allocation3], 4294967168 }
 0x1c4   :  { %212 = vsyncpa [#allocation3], 1 }

</bundles_post_ra>
